<compile_context>
chip_gen: v7x
topology: tpu7x:2x2x1
jax: 0.10.0
libtpu: 0.0.40
codegen_flags: <defaults>
</compile_context>

<pallas_src>
import jax
import jax.numpy as jnp
from jax import lax
from jax.experimental import pallas as pl
from jax.experimental.pallas import tpu as pltpu

EPS = 1e-20          # CRW EPS
ZS_EPS = 1e-5        # ZeroSoftmax eps

# ------------------------- small, forward-consistent config -------------------------
B = 2                # batch
T = 4                # frames
N_PATCH = 4          # patches per frame (N)
C_IN = 3             # RGB
HW_IN = 16           # patch spatial size h = w
K_ENC = 8            # encoder stand-in: patch-embed kernel == stride
H_FEAT = HW_IN // K_ENC          # encoder output spatial size (2)
HWF = H_FEAT * H_FEAT            # spatial positions per frame feature map (4)
ENC_HID = 32         # encoder hidden dim
HEAD_OUT = 128       # selfsim_fc output dim (projection head -> node feature dim C)
TEMP = 0.07          # temperature
NW = T - 2           # number of cycle walks

CKK = C_IN * K_ENC * K_ENC       # 192 : per-spatial-position patch length
WIDE_K = HWF * CKK               # 768 : fused K dim of the encoder matmul
ENC_WIDE = HWF * ENC_HID         # 128 : spatial-major encoder feature width
TN = T * N_PATCH                 # 16  : nodes per batch element


def _zero_softmax(x):
    # ZeroSoftmax: (exp(x)-1)^2 normalized along the last dim.
    e = jnp.exp(x) - 1.0
    e = e * e
    return e / (jnp.sum(e, axis=-1, keepdims=True) + ZS_EPS)


# ------------------------------- fused CRW kernel ------------------------------------
def _crw_fused_kernel(p_ref, wenc_ref, whead_ref, q_ref, stats_ref):
    # p_ref     : (1, TN, WIDE_K)      bf16  patch rows for this batch element (t,n major)
    # wenc_ref  : (WIDE_K, ENC_WIDE)   bf16  block-diagonal encoder weight
    # whead_ref : (ENC_WIDE, HEAD_OUT) bf16  pool-folded head weight
    # q_ref     : (1, TN, HEAD_OUT)    f32   L2-normalized node features (lane-dense)
    # stats_ref : (1, NW, 2)           f32   [:, w, 0]=xent loss, [:, w, 1]=acc
    n = N_PATCH

    # ---- encoder stand-in (patch embed) : (16,768) @ (768,128) -> (16,128) f32 ----
    enc_wide = jnp.dot(p_ref[0], wenc_ref[...], preferred_element_type=jnp.float32)

    # ---- spatial mean-pool + selfsim_fc folded into one 128x128 MXU matmul ----
    y = jnp.dot(enc_wide.astype(jnp.bfloat16), whead_ref[...],
                preferred_element_type=jnp.float32)            # (TN, HEAD_OUT)

    # ---- F.normalize(p=2, dim=channel): rsqrt on EUP; eps 1e-12 on norm == 1e-24 sq ----
    sumsq = jnp.sum(y * y, axis=-1, keepdims=True)
    q = y * lax.rsqrt(jnp.maximum(sumsq, 1e-24))
    q_ref[0] = q

    # ---- batched affinity: one Gram matrix per batch; G is symmetric (q @ q.T) ----
    g = lax.dot_general(q, q, (((1,), (1,)), ((), ())),
                        preferred_element_type=jnp.float32)    # (TN, TN) f32
    inv_temp = 1.0 / TEMP

    # A12[t] = ZeroSoftmax(<q_t, q_{t+1}> / T) ; A21[t] = ZeroSoftmax(<q_{t+1}, q_t> / T)
    # Both are blocks of the same symmetric Gram matrix -> no extra matmul, no transpose.
    a12, a21 = [], []
    for t in range(T - 1):
        a12.append(_zero_softmax(g[t * n:(t + 1) * n, (t + 1) * n:(t + 2) * n] * inv_temp))
        a21.append(_zero_softmax(g[(t + 1) * n:(t + 2) * n, t * n:(t + 1) * n] * inv_temp))

    # ---- palindromic cycle walks with incremental prefix/suffix products ----
    row = lax.broadcasted_iota(jnp.int32, (n, n), 0)
    col = lax.broadcasted_iota(jnp.int32, (n, n), 1)
    ridx = lax.broadcasted_iota(jnp.int32, (NW, 2), 0)
    cidx = lax.broadcasted_iota(jnp.int32, (NW, 2), 1)
    stats = jnp.zeros((NW, 2), jnp.float32)

    left = a12[0]       # a12[0] @ ... @ a12[i]
    right = a21[0]      # a21[i] @ ... @ a21[0]
    for i in range(1, T - 1):
        left = jnp.dot(left, a12[i], preferred_element_type=jnp.float32)
        right = jnp.dot(a21[i], right, preferred_element_type=jnp.float32)
        aa = jnp.dot(left, right, preferred_element_type=jnp.float32)      # (n, n)

        logits = jnp.log(aa + EPS)
        m = jnp.max(logits, axis=-1, keepdims=True)
        lse = m + jnp.log(jnp.sum(jnp.exp(logits - m), axis=-1, keepdims=True))
        diag = jnp.sum(jnp.where(row == col, logits, 0.0), axis=-1, keepdims=True)
        loss = jnp.sum(lse - diag) * (1.0 / n)          # CE vs identity targets, row-mean
        first_max = jnp.min(jnp.where(logits >= m, col, n), axis=-1, keepdims=True)
        acc = jnp.sum((first_max == row[:, :1]).astype(jnp.float32)) * (1.0 / n)

        w = i - 1
        stats = jnp.where((ridx == w) & (cidx == 0), loss, stats)
        stats = jnp.where((ridx == w) & (cidx == 1), acc, stats)

    stats_ref[0] = stats


# --------------------------------- CRW.forward ---------------------------------------
def crw_forward(x, w_enc, w_head):
    """x: (B, T, N*C, H, W) float32 ; returns (q, loss, diags) like CRW.forward."""
    Bx, Tx, NC, H, W = x.shape
    n_patch = NC // C_IN
    tn = Tx * n_patch
    nw = Tx - 2

    # im2col in the wrapper (tiny, fused by XLA): (B,T,N*C,H,W) ->
    #   rows ordered (t, n), row layout (h', w')-major then (c, kh, kw).
    x8 = x.reshape(Bx, Tx, n_patch, C_IN, H_FEAT, K_ENC, H_FEAT, K_ENC)
    p = x8.transpose(0, 1, 2, 4, 6, 3, 5, 7)                    # (B,T,N,H',W',C,kh,kw)
    p_wide = p.reshape(Bx, tn, WIDE_K).astype(jnp.bfloat16)

    # Fold the per-spatial-position encoder conv into a block-diagonal weight and
    # the spatial mean-pool into the head weight (both MXU-aligned, bf16 in / f32 acc).
    w_enc_bd = jnp.kron(jnp.eye(HWF, dtype=w_enc.dtype), w_enc).astype(jnp.bfloat16)
    w_head_tiled = (jnp.tile(w_head, (HWF, 1)) * (1.0 / HWF)).astype(jnp.bfloat16)

    q_rows, stats = pl.pallas_call(
        _crw_fused_kernel,
        out_shape=(jax.ShapeDtypeStruct((Bx, tn, HEAD_OUT), jnp.float32),
                   jax.ShapeDtypeStruct((Bx, nw, 2), jnp.float32)),
        grid_spec=pltpu.PrefetchScalarGridSpec(
            num_scalar_prefetch=0,
            grid=(Bx,),
            in_specs=[pl.BlockSpec((1, tn, WIDE_K), lambda b: (b, 0, 0)),
                      pl.BlockSpec((WIDE_K, ENC_WIDE), lambda b: (0, 0)),
                      pl.BlockSpec((ENC_WIDE, HEAD_OUT), lambda b: (0, 0))],
            out_specs=(pl.BlockSpec((1, tn, HEAD_OUT), lambda b: (b, 0, 0)),
                       pl.BlockSpec((1, nw, 2), lambda b: (b, 0, 0)))),
        compiler_params=pltpu.CompilerParams(dimension_semantics=("parallel",)),
    )(p_wide, w_enc_bd, w_head_tiled)

    # Single layout change to the PyTorch convention (B, C, T, N).
    q = q_rows.reshape(Bx, Tx, n_patch, HEAD_OUT).transpose(0, 3, 1, 2)

    walk_losses = stats[:, :, 0].mean(axis=0)                   # mean over batch
    walk_accs = stats[:, :, 1].mean(axis=0)

    diags = {}
    for w_i, i in enumerate(range(1, Tx - 1)):
        diags[f'{H} xent cyc r{i}'] = walk_losses[w_i]
        diags[f'{H} acc cyc r{i}'] = walk_accs[w_i]

    nwalks = max(1, Tx - 2)
    loss = jnp.reshape(jnp.sum(walk_losses), (1,)) / nwalks     # (0 + sum)/len(walks)
    return q, loss, diags


# ------------------------------------- main -------------------------------------------
if __name__ == "__main__":
    key = jax.random.PRNGKey(0)
    k_x, k_enc, k_head = jax.random.split(key, 3)

    # deterministic synthetic parameters (encoder stand-in + selfsim_fc Linear, no bias)
    w_enc = (jax.random.normal(k_enc, (CKK, ENC_HID), jnp.float32) * 0.05)
    bound = 1.0 / (ENC_HID ** 0.5)
    w_head = jax.random.uniform(k_head, (ENC_HID, HEAD_OUT), jnp.float32, -bound, bound)

    # input video of patches: B x T x (N*C) x H x W
    x = jax.random.normal(k_x, (B, T, N_PATCH * C_IN, HW_IN, HW_IN), jnp.float32)

    fwd = jax.jit(crw_forward)
    q, loss, diags = fwd(x, w_enc, w_head)
    jax.block_until_ready(q)
    jax.block_until_ready(loss)
    jax.block_until_ready(diags)

    assert q.shape == (B, HEAD_OUT, T, N_PATCH)
    assert loss.shape == (1,)
    print("KERNEL_OK")
</pallas_src>

<mosaic_0001>
module attributes {stable_mosaic.version = 11 : i64} {
  func.func @_crw_fused_kernel(%arg0: i32, %arg1: memref<1x16x768xbf16, #tpu.memory_space<vmem>>, %arg2: memref<768x128xbf16, #tpu.memory_space<vmem>>, %arg3: memref<128x128xbf16, #tpu.memory_space<vmem>>, %arg4: memref<1x16x128xf32, #tpu.memory_space<vmem>>, %arg5: memref<1x2x2xf32, #tpu.memory_space<vmem>>) attributes {dimension_semantics = [#tpu.dimension_semantics<parallel>], iteration_bounds = array<i64: 2>, scalar_prefetch = 0 : i64, scratch_operands = 0 : i64, tpu.core_type = #tpu.core_type<tc>, window_params = [{transform_indices = @transform_0, window_bounds = array<i64: 1, 16, 768>}, {pipeline_mode = #tpu.pipeline_mode<synchronous>, transform_indices = @transform_1, window_bounds = array<i64: 768, 128>}, {pipeline_mode = #tpu.pipeline_mode<synchronous>, transform_indices = @transform_2, window_bounds = array<i64: 128, 128>}, {transform_indices = @transform_3, window_bounds = array<i64: 1, 16, 128>}, {transform_indices = @transform_4, window_bounds = array<i64: 1, 2, 2>}]} {
    %c0 = arith.constant 0 : index
    %c0_0 = arith.constant 0 : index
    %c0_1 = arith.constant 0 : index
    %0 = vector.load %arg1[%c0, %c0_0, %c0_1] : memref<1x16x768xbf16, #tpu.memory_space<vmem>>, vector<1x16x768xbf16>
    %1 = vector.shape_cast %0 : vector<1x16x768xbf16> to vector<16x768xbf16>
    %c0_2 = arith.constant 0 : index
    %c0_3 = arith.constant 0 : index
    %2 = vector.load %arg2[%c0_2, %c0_3] : memref<768x128xbf16, #tpu.memory_space<vmem>>, vector<768x128xbf16>
    %cst = arith.constant dense<0.000000e+00> : vector<16x128xf32>
    %3 = tpu.matmul %1, %2, %cst {dimension_numbers = #tpu.dot_dimension_numbers<[1], [0], [0], [1], [0, 0, 1, 1], [], []>} : vector<16x768xbf16>, vector<768x128xbf16>, vector<16x128xf32> -> vector<16x128xf32>
    %4 = arith.truncf %3 : vector<16x128xf32> to vector<16x128xbf16>
    %c0_4 = arith.constant 0 : index
    %c0_5 = arith.constant 0 : index
    %5 = vector.load %arg3[%c0_4, %c0_5] : memref<128x128xbf16, #tpu.memory_space<vmem>>, vector<128x128xbf16>
    %cst_6 = arith.constant dense<0.000000e+00> : vector<16x128xf32>
    %6 = tpu.matmul %4, %5, %cst_6 {dimension_numbers = #tpu.dot_dimension_numbers<[1], [0], [0], [1], [0, 0, 1, 1], [], []>} : vector<16x128xbf16>, vector<128x128xbf16>, vector<16x128xf32> -> vector<16x128xf32>
    %7 = arith.mulf %6, %6 : vector<16x128xf32>
    %cst_7 = arith.constant dense<0.000000e+00> : vector<16xf32>
    %8 = vector.multi_reduction <add>, %7, %cst_7 [1] : vector<16x128xf32> to vector<16xf32>
    %9 = vector.shape_cast %8 : vector<16xf32> to vector<16x1xf32>
    %cst_8 = arith.constant 1.000000e-24 : f32
    %10 = vector.broadcast %cst_8 : f32 to vector<16x1xf32>
    %11 = arith.maximumf %9, %10 : vector<16x1xf32>
    %12 = math.rsqrt %11 : vector<16x1xf32>
    %13 = vector.broadcast %12 : vector<16x1xf32> to vector<16x128xf32>
    %14 = arith.mulf %6, %13 : vector<16x128xf32>
    %c0_9 = arith.constant 0 : index
    %c0_10 = arith.constant 0 : index
    %c0_11 = arith.constant 0 : index
    %15 = vector.load %arg4[%c0_9, %c0_10, %c0_11] : memref<1x16x128xf32, #tpu.memory_space<vmem>>, vector<1x16x128xf32>
    %16 = vector.shape_cast %15 : vector<1x16x128xf32> to vector<16x128xf32>
    %17 = vector.shape_cast %14 : vector<16x128xf32> to vector<1x16x128xf32>
    tpu.vector_store %arg4[%c0_9, %c0_10, %c0_11], %17 {strides = array<i32>} : memref<1x16x128xf32, #tpu.memory_space<vmem>>, vector<1x16x128xf32>,
    %cst_12 = arith.constant dense<0.000000e+00> : vector<16x16xf32>
    %18 = tpu.matmul %14, %14, %cst_12 {dimension_numbers = #tpu.dot_dimension_numbers<[1], [1], [0], [0], [0, 0, 1, 0], [], []>} : vector<16x128xf32>, vector<16x128xf32>, vector<16x16xf32> -> vector<16x16xf32>
    %19 = vector.extract_strided_slice %18 {offsets = [0, 4], sizes = [4, 4], strides = [1, 1]} : vector<16x16xf32> to vector<4x4xf32>
    %cst_13 = arith.constant 14.2857141 : f32
    %20 = vector.broadcast %cst_13 : f32 to vector<4x4xf32>
    %21 = arith.mulf %19, %20 : vector<4x4xf32>
    %22 = math.exp %21 : vector<4x4xf32>
    %cst_14 = arith.constant 1.000000e+00 : f32
    %23 = vector.broadcast %cst_14 : f32 to vector<4x4xf32>
    %24 = arith.subf %22, %23 : vector<4x4xf32>
    %25 = arith.mulf %24, %24 : vector<4x4xf32>
    %cst_15 = arith.constant dense<0.000000e+00> : vector<4xf32>
    %26 = vector.multi_reduction <add>, %25, %cst_15 [1] : vector<4x4xf32> to vector<4xf32>
    %27 = vector.shape_cast %26 : vector<4xf32> to vector<4x1xf32>
    %cst_16 = arith.constant 9.99999974E-6 : f32
    %28 = vector.broadcast %cst_16 : f32 to vector<4x1xf32>
    %29 = arith.addf %27, %28 : vector<4x1xf32>
    %30 = vector.broadcast %29 : vector<4x1xf32> to vector<4x4xf32>
    %31 = arith.divf %25, %30 : vector<4x4xf32>
    %32 = vector.extract_strided_slice %18 {offsets = [4, 0], sizes = [4, 4], strides = [1, 1]} : vector<16x16xf32> to vector<4x4xf32>
    %cst_17 = arith.constant 14.2857141 : f32
    %33 = vector.broadcast %cst_17 : f32 to vector<4x4xf32>
    %34 = arith.mulf %32, %33 : vector<4x4xf32>
    %35 = math.exp %34 : vector<4x4xf32>
    %cst_18 = arith.constant 1.000000e+00 : f32
    %36 = vector.broadcast %cst_18 : f32 to vector<4x4xf32>
    %37 = arith.subf %35, %36 : vector<4x4xf32>
    %38 = arith.mulf %37, %37 : vector<4x4xf32>
    %cst_19 = arith.constant dense<0.000000e+00> : vector<4xf32>
    %39 = vector.multi_reduction <add>, %38, %cst_19 [1] : vector<4x4xf32> to vector<4xf32>
    %40 = vector.shape_cast %39 : vector<4xf32> to vector<4x1xf32>
    %cst_20 = arith.constant 9.99999974E-6 : f32
    %41 = vector.broadcast %cst_20 : f32 to vector<4x1xf32>
    %42 = arith.addf %40, %41 : vector<4x1xf32>
    %43 = vector.broadcast %42 : vector<4x1xf32> to vector<4x4xf32>
    %44 = arith.divf %38, %43 : vector<4x4xf32>
    %45 = vector.extract_strided_slice %18 {offsets = [4, 8], sizes = [4, 4], strides = [1, 1]} : vector<16x16xf32> to vector<4x4xf32>
    %cst_21 = arith.constant 14.2857141 : f32
    %46 = vector.broadcast %cst_21 : f32 to vector<4x4xf32>
    %47 = arith.mulf %45, %46 : vector<4x4xf32>
    %48 = math.exp %47 : vector<4x4xf32>
    %cst_22 = arith.constant 1.000000e+00 : f32
    %49 = vector.broadcast %cst_22 : f32 to vector<4x4xf32>
    %50 = arith.subf %48, %49 : vector<4x4xf32>
    %51 = arith.mulf %50, %50 : vector<4x4xf32>
    %cst_23 = arith.constant dense<0.000000e+00> : vector<4xf32>
    %52 = vector.multi_reduction <add>, %51, %cst_23 [1] : vector<4x4xf32> to vector<4xf32>
    %53 = vector.shape_cast %52 : vector<4xf32> to vector<4x1xf32>
    %cst_24 = arith.constant 9.99999974E-6 : f32
    %54 = vector.broadcast %cst_24 : f32 to vector<4x1xf32>
    %55 = arith.addf %53, %54 : vector<4x1xf32>
    %56 = vector.broadcast %55 : vector<4x1xf32> to vector<4x4xf32>
    %57 = arith.divf %51, %56 : vector<4x4xf32>
    %58 = vector.extract_strided_slice %18 {offsets = [8, 4], sizes = [4, 4], strides = [1, 1]} : vector<16x16xf32> to vector<4x4xf32>
    %cst_25 = arith.constant 14.2857141 : f32
    %59 = vector.broadcast %cst_25 : f32 to vector<4x4xf32>
    %60 = arith.mulf %58, %59 : vector<4x4xf32>
    %61 = math.exp %60 : vector<4x4xf32>
    %cst_26 = arith.constant 1.000000e+00 : f32
    %62 = vector.broadcast %cst_26 : f32 to vector<4x4xf32>
    %63 = arith.subf %61, %62 : vector<4x4xf32>
    %64 = arith.mulf %63, %63 : vector<4x4xf32>
    %cst_27 = arith.constant dense<0.000000e+00> : vector<4xf32>
    %65 = vector.multi_reduction <add>, %64, %cst_27 [1] : vector<4x4xf32> to vector<4xf32>
    %66 = vector.shape_cast %65 : vector<4xf32> to vector<4x1xf32>
    %cst_28 = arith.constant 9.99999974E-6 : f32
    %67 = vector.broadcast %cst_28 : f32 to vector<4x1xf32>
    %68 = arith.addf %66, %67 : vector<4x1xf32>
    %69 = vector.broadcast %68 : vector<4x1xf32> to vector<4x4xf32>
    %70 = arith.divf %64, %69 : vector<4x4xf32>
    %71 = vector.extract_strided_slice %18 {offsets = [8, 12], sizes = [4, 4], strides = [1, 1]} : vector<16x16xf32> to vector<4x4xf32>
    %cst_29 = arith.constant 14.2857141 : f32
    %72 = vector.broadcast %cst_29 : f32 to vector<4x4xf32>
    %73 = arith.mulf %71, %72 : vector<4x4xf32>
    %74 = math.exp %73 : vector<4x4xf32>
    %cst_30 = arith.constant 1.000000e+00 : f32
    %75 = vector.broadcast %cst_30 : f32 to vector<4x4xf32>
    %76 = arith.subf %74, %75 : vector<4x4xf32>
    %77 = arith.mulf %76, %76 : vector<4x4xf32>
    %cst_31 = arith.constant dense<0.000000e+00> : vector<4xf32>
    %78 = vector.multi_reduction <add>, %77, %cst_31 [1] : vector<4x4xf32> to vector<4xf32>
    %79 = vector.shape_cast %78 : vector<4xf32> to vector<4x1xf32>
    %cst_32 = arith.constant 9.99999974E-6 : f32
    %80 = vector.broadcast %cst_32 : f32 to vector<4x1xf32>
    %81 = arith.addf %79, %80 : vector<4x1xf32>
    %82 = vector.broadcast %81 : vector<4x1xf32> to vector<4x4xf32>
    %83 = arith.divf %77, %82 : vector<4x4xf32>
    %84 = vector.extract_strided_slice %18 {offsets = [12, 8], sizes = [4, 4], strides = [1, 1]} : vector<16x16xf32> to vector<4x4xf32>
    %cst_33 = arith.constant 14.2857141 : f32
    %85 = vector.broadcast %cst_33 : f32 to vector<4x4xf32>
    %86 = arith.mulf %84, %85 : vector<4x4xf32>
    %87 = math.exp %86 : vector<4x4xf32>
    %cst_34 = arith.constant 1.000000e+00 : f32
    %88 = vector.broadcast %cst_34 : f32 to vector<4x4xf32>
    %89 = arith.subf %87, %88 : vector<4x4xf32>
    %90 = arith.mulf %89, %89 : vector<4x4xf32>
    %cst_35 = arith.constant dense<0.000000e+00> : vector<4xf32>
    %91 = vector.multi_reduction <add>, %90, %cst_35 [1] : vector<4x4xf32> to vector<4xf32>
    %92 = vector.shape_cast %91 : vector<4xf32> to vector<4x1xf32>
    %cst_36 = arith.constant 9.99999974E-6 : f32
    %93 = vector.broadcast %cst_36 : f32 to vector<4x1xf32>
    %94 = arith.addf %92, %93 : vector<4x1xf32>
    %95 = vector.broadcast %94 : vector<4x1xf32> to vector<4x4xf32>
    %96 = arith.divf %90, %95 : vector<4x4xf32>
    %97 = tpu.iota {dimensions = array<i32: 0>} : vector<4x4xi32>
    %98 = tpu.iota {dimensions = array<i32: 1>} : vector<4x4xi32>
    %99 = tpu.iota {dimensions = array<i32: 0>} : vector<2x2xi32>
    %100 = tpu.iota {dimensions = array<i32: 1>} : vector<2x2xi32>
    %cst_37 = arith.constant 0.000000e+00 : f32
    %101 = vector.broadcast %cst_37 : f32 to vector<2x2xf32>
    %cst_38 = arith.constant dense<0.000000e+00> : vector<4x4xf32>
    %102 = tpu.matmul %31, %57, %cst_38 {dimension_numbers = #tpu.dot_dimension_numbers<[1], [0], [0], [1], [0, 0, 1, 1], [], []>} : vector<4x4xf32>, vector<4x4xf32>, vector<4x4xf32> -> vector<4x4xf32>
    %cst_39 = arith.constant dense<0.000000e+00> : vector<4x4xf32>
    %103 = tpu.matmul %70, %44, %cst_39 {dimension_numbers = #tpu.dot_dimension_numbers<[1], [0], [0], [1], [0, 0, 1, 1], [], []>} : vector<4x4xf32>, vector<4x4xf32>, vector<4x4xf32> -> vector<4x4xf32>
    %cst_40 = arith.constant dense<0.000000e+00> : vector<4x4xf32>
    %104 = tpu.matmul %102, %103, %cst_40 {dimension_numbers = #tpu.dot_dimension_numbers<[1], [0], [0], [1], [0, 0, 1, 1], [], []>} : vector<4x4xf32>, vector<4x4xf32>, vector<4x4xf32> -> vector<4x4xf32>
    %cst_41 = arith.constant 9.99999968E-21 : f32
    %105 = vector.broadcast %cst_41 : f32 to vector<4x4xf32>
    %106 = arith.addf %104, %105 : vector<4x4xf32>
    %107 = math.log %106 : vector<4x4xf32>
    %cst_42 = arith.constant dense<0xFF800000> : vector<4xf32>
    %108 = vector.multi_reduction <maximumf>, %107, %cst_42 [1] : vector<4x4xf32> to vector<4xf32>
    %109 = vector.shape_cast %108 : vector<4xf32> to vector<4x1xf32>
    %110 = vector.broadcast %109 : vector<4x1xf32> to vector<4x4xf32>
    %111 = arith.subf %107, %110 : vector<4x4xf32>
    %112 = math.exp %111 : vector<4x4xf32>
    %cst_43 = arith.constant dense<0.000000e+00> : vector<4xf32>
    %113 = vector.multi_reduction <add>, %112, %cst_43 [1] : vector<4x4xf32> to vector<4xf32>
    %114 = vector.shape_cast %113 : vector<4xf32> to vector<4x1xf32>
    %115 = math.log %114 : vector<4x1xf32>
    %116 = arith.addf %109, %115 : vector<4x1xf32>
    %117 = arith.cmpi eq, %97, %98 : vector<4x4xi32>
    %cst_44 = arith.constant 0.000000e+00 : f32
    %118 = vector.broadcast %cst_44 : f32 to vector<4x4xf32>
    %119 = arith.select %117, %107, %118 : vector<4x4xi1>, vector<4x4xf32>
    %cst_45 = arith.constant dense<0.000000e+00> : vector<4xf32>
    %120 = vector.multi_reduction <add>, %119, %cst_45 [1] : vector<4x4xf32> to vector<4xf32>
    %121 = vector.shape_cast %120 : vector<4xf32> to vector<4x1xf32>
    %122 = arith.subf %116, %121 : vector<4x1xf32>
    %123 = vector.shape_cast %122 : vector<4x1xf32> to vector<1x4x1xf32>
    %cst_46 = arith.constant dense<0.000000e+00> : vector<1xf32>
    %124 = vector.multi_reduction <add>, %123, %cst_46 [1, 2] : vector<1x4x1xf32> to vector<1xf32>
    %125 = vector.shape_cast %124 : vector<1xf32> to vector<1x1x1xf32>
    %126 = vector.extract %125[0, 0, 0] : f32 from vector<1x1x1xf32>
    %cst_47 = arith.constant 2.500000e-01 : f32
    %127 = arith.mulf %126, %cst_47 : f32
    %128 = vector.broadcast %109 : vector<4x1xf32> to vector<4x4xf32>
    %129 = arith.cmpf oge, %107, %128 : vector<4x4xf32>
    %c4_i32 = arith.constant 4 : i32
    %130 = vector.broadcast %c4_i32 : i32 to vector<4x4xi32>
    %131 = arith.select %129, %98, %130 : vector<4x4xi1>, vector<4x4xi32>
    %cst_48 = arith.constant dense<2147483647> : vector<4xi32>
    %132 = vector.multi_reduction <minsi>, %131, %cst_48 [1] : vector<4x4xi32> to vector<4xi32>
    %133 = vector.shape_cast %132 : vector<4xi32> to vector<4x1xi32>
    %134 = vector.extract_strided_slice %97 {offsets = [0, 0], sizes = [4, 1], strides = [1, 1]} : vector<4x4xi32> to vector<4x1xi32>
    %135 = arith.cmpi eq, %133, %134 : vector<4x1xi32>
    %136 = arith.extui %135 : vector<4x1xi1> to vector<4x1xi32>
    %137 = arith.sitofp %136 : vector<4x1xi32> to vector<4x1xf32>
    %138 = vector.shape_cast %137 : vector<4x1xf32> to vector<1x4x1xf32>
    %cst_49 = arith.constant dense<0.000000e+00> : vector<1xf32>
    %139 = vector.multi_reduction <add>, %138, %cst_49 [1, 2] : vector<1x4x1xf32> to vector<1xf32>
    %140 = vector.shape_cast %139 : vector<1xf32> to vector<1x1x1xf32>
    %141 = vector.extract %140[0, 0, 0] : f32 from vector<1x1x1xf32>
    %cst_50 = arith.constant 2.500000e-01 : f32
    %142 = arith.mulf %141, %cst_50 : f32
    %c0_i32 = arith.constant 0 : i32
    %143 = vector.broadcast %c0_i32 : i32 to vector<2x2xi32>
    %144 = arith.cmpi eq, %99, %143 : vector<2x2xi32>
    %c0_i32_51 = arith.constant 0 : i32
    %145 = vector.broadcast %c0_i32_51 : i32 to vector<2x2xi32>
    %146 = arith.cmpi eq, %100, %145 : vector<2x2xi32>
    %147 = arith.andi %144, %146 : vector<2x2xi1>
    %148 = vector.broadcast %127 : f32 to vector<2x2xf32>
    %149 = arith.select %147, %148, %101 : vector<2x2xi1>, vector<2x2xf32>
    %c0_i32_52 = arith.constant 0 : i32
    %150 = vector.broadcast %c0_i32_52 : i32 to vector<2x2xi32>
    %151 = arith.cmpi eq, %99, %150 : vector<2x2xi32>
    %c1_i32 = arith.constant 1 : i32
    %152 = vector.broadcast %c1_i32 : i32 to vector<2x2xi32>
    %153 = arith.cmpi eq, %100, %152 : vector<2x2xi32>
    %154 = arith.andi %151, %153 : vector<2x2xi1>
    %155 = vector.broadcast %142 : f32 to vector<2x2xf32>
    %156 = arith.select %154, %155, %149 : vector<2x2xi1>, vector<2x2xf32>
    %cst_53 = arith.constant dense<0.000000e+00> : vector<4x4xf32>
    %157 = tpu.matmul %102, %83, %cst_53 {dimension_numbers = #tpu.dot_dimension_numbers<[1], [0], [0], [1], [0, 0, 1, 1], [], []>} : vector<4x4xf32>, vector<4x4xf32>, vector<4x4xf32> -> vector<4x4xf32>
    %cst_54 = arith.constant dense<0.000000e+00> : vector<4x4xf32>
    %158 = tpu.matmul %96, %103, %cst_54 {dimension_numbers = #tpu.dot_dimension_numbers<[1], [0], [0], [1], [0, 0, 1, 1], [], []>} : vector<4x4xf32>, vector<4x4xf32>, vector<4x4xf32> -> vector<4x4xf32>
    %cst_55 = arith.constant dense<0.000000e+00> : vector<4x4xf32>
    %159 = tpu.matmul %157, %158, %cst_55 {dimension_numbers = #tpu.dot_dimension_numbers<[1], [0], [0], [1], [0, 0, 1, 1], [], []>} : vector<4x4xf32>, vector<4x4xf32>, vector<4x4xf32> -> vector<4x4xf32>
    %cst_56 = arith.constant 9.99999968E-21 : f32
    %160 = vector.broadcast %cst_56 : f32 to vector<4x4xf32>
    %161 = arith.addf %159, %160 : vector<4x4xf32>
    %162 = math.log %161 : vector<4x4xf32>
    %cst_57 = arith.constant dense<0xFF800000> : vector<4xf32>
    %163 = vector.multi_reduction <maximumf>, %162, %cst_57 [1] : vector<4x4xf32> to vector<4xf32>
    %164 = vector.shape_cast %163 : vector<4xf32> to vector<4x1xf32>
    %165 = vector.broadcast %164 : vector<4x1xf32> to vector<4x4xf32>
    %166 = arith.subf %162, %165 : vector<4x4xf32>
    %167 = math.exp %166 : vector<4x4xf32>
    %cst_58 = arith.constant dense<0.000000e+00> : vector<4xf32>
    %168 = vector.multi_reduction <add>, %167, %cst_58 [1] : vector<4x4xf32> to vector<4xf32>
    %169 = vector.shape_cast %168 : vector<4xf32> to vector<4x1xf32>
    %170 = math.log %169 : vector<4x1xf32>
    %171 = arith.addf %164, %170 : vector<4x1xf32>
    %172 = arith.cmpi eq, %97, %98 : vector<4x4xi32>
    %cst_59 = arith.constant 0.000000e+00 : f32
    %173 = vector.broadcast %cst_59 : f32 to vector<4x4xf32>
    %174 = arith.select %172, %162, %173 : vector<4x4xi1>, vector<4x4xf32>
    %cst_60 = arith.constant dense<0.000000e+00> : vector<4xf32>
    %175 = vector.multi_reduction <add>, %174, %cst_60 [1] : vector<4x4xf32> to vector<4xf32>
    %176 = vector.shape_cast %175 : vector<4xf32> to vector<4x1xf32>
    %177 = arith.subf %171, %176 : vector<4x1xf32>
    %178 = vector.shape_cast %177 : vector<4x1xf32> to vector<1x4x1xf32>
    %cst_61 = arith.constant dense<0.000000e+00> : vector<1xf32>
    %179 = vector.multi_reduction <add>, %178, %cst_61 [1, 2] : vector<1x4x1xf32> to vector<1xf32>
    %180 = vector.shape_cast %179 : vector<1xf32> to vector<1x1x1xf32>
    %181 = vector.extract %180[0, 0, 0] : f32 from vector<1x1x1xf32>
    %cst_62 = arith.constant 2.500000e-01 : f32
    %182 = arith.mulf %181, %cst_62 : f32
    %183 = vector.broadcast %164 : vector<4x1xf32> to vector<4x4xf32>
    %184 = arith.cmpf oge, %162, %183 : vector<4x4xf32>
    %c4_i32_63 = arith.constant 4 : i32
    %185 = vector.broadcast %c4_i32_63 : i32 to vector<4x4xi32>
    %186 = arith.select %184, %98, %185 : vector<4x4xi1>, vector<4x4xi32>
    %cst_64 = arith.constant dense<2147483647> : vector<4xi32>
    %187 = vector.multi_reduction <minsi>, %186, %cst_64 [1] : vector<4x4xi32> to vector<4xi32>
    %188 = vector.shape_cast %187 : vector<4xi32> to vector<4x1xi32>
    %189 = vector.extract_strided_slice %97 {offsets = [0, 0], sizes = [4, 1], strides = [1, 1]} : vector<4x4xi32> to vector<4x1xi32>
    %190 = arith.cmpi eq, %188, %189 : vector<4x1xi32>
    %191 = arith.extui %190 : vector<4x1xi1> to vector<4x1xi32>
    %192 = arith.sitofp %191 : vector<4x1xi32> to vector<4x1xf32>
    %193 = vector.shape_cast %192 : vector<4x1xf32> to vector<1x4x1xf32>
    %cst_65 = arith.constant dense<0.000000e+00> : vector<1xf32>
    %194 = vector.multi_reduction <add>, %193, %cst_65 [1, 2] : vector<1x4x1xf32> to vector<1xf32>
    %195 = vector.shape_cast %194 : vector<1xf32> to vector<1x1x1xf32>
    %196 = vector.extract %195[0, 0, 0] : f32 from vector<1x1x1xf32>
    %cst_66 = arith.constant 2.500000e-01 : f32
    %197 = arith.mulf %196, %cst_66 : f32
    %c1_i32_67 = arith.constant 1 : i32
    %198 = vector.broadcast %c1_i32_67 : i32 to vector<2x2xi32>
    %199 = arith.cmpi eq, %99, %198 : vector<2x2xi32>
    %c0_i32_68 = arith.constant 0 : i32
    %200 = vector.broadcast %c0_i32_68 : i32 to vector<2x2xi32>
    %201 = arith.cmpi eq, %100, %200 : vector<2x2xi32>
    %202 = arith.andi %199, %201 : vector<2x2xi1>
    %203 = vector.broadcast %182 : f32 to vector<2x2xf32>
    %204 = arith.select %202, %203, %156 : vector<2x2xi1>, vector<2x2xf32>
    %c1_i32_69 = arith.constant 1 : i32
    %205 = vector.broadcast %c1_i32_69 : i32 to vector<2x2xi32>
    %206 = arith.cmpi eq, %99, %205 : vector<2x2xi32>
    %c1_i32_70 = arith.constant 1 : i32
    %207 = vector.broadcast %c1_i32_70 : i32 to vector<2x2xi32>
    %208 = arith.cmpi eq, %100, %207 : vector<2x2xi32>
    %209 = arith.andi %206, %208 : vector<2x2xi1>
    %210 = vector.broadcast %197 : f32 to vector<2x2xf32>
    %211 = arith.select %209, %210, %204 : vector<2x2xi1>, vector<2x2xf32>
    %c0_71 = arith.constant 0 : index
    %c0_72 = arith.constant 0 : index
    %c0_73 = arith.constant 0 : index
    %212 = vector.load %arg5[%c0_71, %c0_72, %c0_73] : memref<1x2x2xf32, #tpu.memory_space<vmem>>, vector<1x2x2xf32>
    %213 = vector.shape_cast %212 : vector<1x2x2xf32> to vector<2x2xf32>
    %214 = vector.shape_cast %211 : vector<2x2xf32> to vector<1x2x2xf32>
    tpu.vector_store %arg5[%c0_71, %c0_72, %c0_73], %214 {strides = array<i32>} : memref<1x2x2xf32, #tpu.memory_space<vmem>>, vector<1x2x2xf32>,
    return
  }
  func.func @transform_0(%arg0: i32) -> (i32, i32, i32) {
    %c0_i32 = arith.constant 0 : i32
    %c0_i32_0 = arith.constant 0 : i32
    %c0_i32_1 = arith.constant 0 : i32
    return %arg0, %c0_i32, %c0_i32_0 : i32, i32, i32
  }
  func.func @transform_1(%arg0: i32) -> (i32, i32) {
    %c0_i32 = arith.constant 0 : i32
    %c0_i32_0 = arith.constant 0 : i32
    %c0_i32_1 = arith.constant 0 : i32
    return %c0_i32, %c0_i32_0 : i32, i32
  }
  func.func @transform_2(%arg0: i32) -> (i32, i32) {
    %c0_i32 = arith.constant 0 : i32
    %c0_i32_0 = arith.constant 0 : i32
    %c0_i32_1 = arith.constant 0 : i32
    return %c0_i32, %c0_i32_0 : i32, i32
  }
  func.func @transform_3(%arg0: i32) -> (i32, i32, i32) {
    %c0_i32 = arith.constant 0 : i32
    %c0_i32_0 = arith.constant 0 : i32
    %c0_i32_1 = arith.constant 0 : i32
    return %arg0, %c0_i32, %c0_i32_0 : i32, i32, i32
  }
  func.func @transform_4(%arg0: i32) -> (i32, i32, i32) {
    %c0_i32 = arith.constant 0 : i32
    %c0_i32_0 = arith.constant 0 : i32
    %c0_i32_1 = arith.constant 0 : i32
    return %arg0, %c0_i32, %c0_i32_0 : i32, i32, i32
  }
}

</mosaic_0001>

<bundles_post_ra>
// kernel: crw_forward.1
= control target key start
LH: loop header
LB: loop body
LE: loop exit
PB: predicated region body
PF: predicated region fallthrough
CT: control target
= control target key end

     0   :  { %10 = vsyncpa [#allocation3], 0  ;;  %s2612_s0 = inlined_call_operand.vmem [shape: bf16[2,16,768], index: 0, kind: input, shape index: {}]   ;;  %s2613_s1 = inlined_call_operand.vmem [shape: bf16[768,128], index: 1, kind: input, shape index: {}]   ;;  %s2614_s2 = inlined_call_operand.vmem [shape: bf16[128,128], index: 2, kind: input, shape index: {}]   ;;  %s2615_s3 = inlined_call_operand.hbm [shape: f32[2,16,128], index: 3, kind: output, shape index: {0}]   ;;  %s2616_s4 = inlined_call_operand.vmem [shape: f32[2,2,2], index: 4, kind: output, shape index: {1}]  }
   0x1   :  { %12 = vsyncpa [#allocation3 + $0x1], 0  ;;  %s2221_s15 = smov 0   ;;  %s2223_s16 = smov 0  }
   0x2   :  { %s2225_s17 = smov 0   ;;  %s2227_s18 = smov 0  }
   0x3 LB: > { %s2242_s19 = sadd.s32 4294967295, %s2186_s18   ;;  %s1729_s20 = sadd.s32 4294967294, %s2186_s18   ;;  %s2186_s18 = sphi %s2227_s18, %s2622_s18   ;;  %s2182_s17 = sphi %s2225_s17, %s2621_s17   ;;  %s2178_s16 = sphi %s2223_s16, %s2620_s16   ;;  %s2174_s15 = sphi %s2221_s15, %s2619_s15  }
   0x4   : > { %s2246_s21 = sadd.s32 1, %s2186_s18   ;;  %s93_s22 = sadd.s32 1, %s2182_s17 }
   0x5   : > { %s90_s23 = ssub.s32 %s2186_s18, %s2246_s21  ;;  %p103_p0 = scmp.ne.s32.totalorder %s2182_s17, %s2178_s16 }
   0x6   : > { %p91_p1 = scmp.eq.s32.totalorder %s90_s23, 0  ;;  %p104_p2 = scmp.eq.s32.totalorder %s2242_s19, 1 }
   0x7   : > { %p109_p3 = scmp.ne.s32.totalorder %s2178_s16, %s2174_s15  ;;  %p110_p4 = scmp.eq.s32.totalorder %s1729_s20, 1 }
   0x8   : > { %s2257_s24 = scalar_select %p91_p1, %s2182_s17, %s93_s22  }
   0x9   : > { %p2259_p5 = por %p104_p2, %p103_p0  ;;  %p2263_p6 = por %p110_p4, %p109_p3 }
   0xa   : > { %p1732_p7 = scmp.ge.s32.totalorder %s2186_s18, 1  ;;  %p168_p8 = scmp.lt.s32.totalorder %s2186_s18, 3 }
   0xc   : > { %p169_p9 = pnand %p1732_p7, %p168_p8 }
   0xd   : > { %v2027_v0 = vld [vmem:[%s2613_s1 + $0x40] sm:$0xff] (!%p169_p9)   ;;  %v2031_v4 = vld [vmem:[%s2613_s1 + $0x48] sm:$0xff] (!%p169_p9)   ;;  %v2035_v8 = vld [vmem:[%s2613_s1 + $0x50] sm:$0xff] (!%p169_p9)   ;;  %p198_p10 = scmp.lt.s32.totalorder (!%p169_p9), %s2242_s19, 1  ;;  %v2188_v55 = vmov (!%p169_p9), 0.0   ;;  %vm2189_vm0 = vmmov (!%p169_p9), 0  }
   0xe   : > { %172 = sbr.rel (%p169_p9) target bundleno = 2685 (0xa7d), region = 32  ;;  %v2028_v1 = vld [vmem:[%s2613_s1 + $0xc0] sm:$0xff] (!%p169_p9)   ;;  %1820 = vmatprep.subr.bf16.mxu0 (!%p169_p9), %v2027_v0  ;;  %v2032_v5 = vld [vmem:[%s2613_s1 + $0xc8] sm:$0xff] (!%p169_p9)   ;;  %v2036_v9 = vld [vmem:[%s2613_s1 + $0xd0] sm:$0xff] (!%p169_p9)   ;;  %s189_s5 = sand.u32 (!%p169_p9), 1, %s2178_s16   ;;  %vm962_vm1 = vcmask (!%p169_p9), 31748  }
   0xf   : > { %v2029_v2 = vld [vmem:[%s2613_s1] sm:$0xff] (!%p169_p9)   ;;  %1842 = vmatprep.subr.bf16.mxu1 (!%p169_p9), %v2028_v1  ;;  %v2033_v6 = vld [vmem:[%s2613_s1 + $0x8] sm:$0xff] (!%p169_p9)   ;;  %v2037_v10 = vld [vmem:[%s2613_s1 + $0x10] sm:$0xff] (!%p169_p9)   ;;  %s1733_s6 = sshll.u32 (!%p169_p9), %s189_s5, 4  ;;  %s2190_s8 = smov (!%p169_p9), 124   ;;  %vm955_vm2 = vcmask (!%p169_p9), 27648  }
  0x10   : > { %v2030_v3 = vld [vmem:[%s2613_s1 + $0x80] sm:$0xff] (!%p169_p9)   ;;  %1821 = vmatpush3.bf16.msra.mxu0 (!%p169_p9), %v2029_v2  ;;  %v2034_v7 = vld [vmem:[%s2613_s1 + $0x88] sm:$0xff] (!%p169_p9)   ;;  %v2038_v11 = vld [vmem:[%s2613_s1 + $0x90] sm:$0xff] (!%p169_p9)   ;;  %s2469_s7 = scalar_lea.vmem (!%p169_p9), [#allocation2], %s1733_s6  ;;  %s2191_s9 = smov (!%p169_p9), 120   ;;  %vm1025_vm3 = vcmask (!%p169_p9), 1043456  }
  0x11   : > { %1843 = vmatpush3.bf16.msra.mxu1 (!%p169_p9), %v2030_v3  ;;  %1822 = vmatprep.subr.bf16.mxu0 (!%p169_p9), %v2031_v4  ;;  %v2039_v12 = vld [vmem:[%s2613_s1 + $0x58] sm:$0xff] (!%p169_p9)   ;;  %v2043_v16 = vld [vmem:[%s2613_s1 + $0x60] sm:$0xff] (!%p169_p9)   ;;  %v2047_v20 = vld [vmem:[%s2613_s1 + $0x68] sm:$0xff] (!%p169_p9)   ;;  %s2192_s10 = smov (!%p169_p9), 116   ;;  %vm1022_vm4 = vcmask (!%p169_p9), 31744   ;;  %vm1273_vm10 = vcmask (!%p169_p9), 3072  }
  0x12   : > { %1844 = vmatprep.subr.bf16.mxu1 (!%p169_p9), %v2032_v5  ;;  %v2040_v13 = vld [vmem:[%s2613_s1 + $0xd8] sm:$0xff] (!%p169_p9)   ;;  %v2044_v17 = vld [vmem:[%s2613_s1 + $0xe0] sm:$0xff] (!%p169_p9)   ;;  %v2048_v21 = vld [vmem:[%s2613_s1 + $0xe8] sm:$0xff] (!%p169_p9)   ;;  %s1640_s22 = sshll.u32 (!%p169_p9), %s2469_s7, 4  ;;  %s2563_s23 = scalar_lea.sflag (!%p169_p9), [#allocation3], %s189_s5  ;;  %s2559_s22 = int_to_ptr.vmem [resolvable:$true] %s1640_s22 }
  0x13   : > { %v2041_v14 = vld [vmem:[%s2613_s1 + $0x18] sm:$0xff] (!%p169_p9)   ;;  %v2045_v18 = vld [vmem:[%s2613_s1 + $0x20] sm:$0xff] (!%p169_p9)   ;;  %v2049_v22 = vld [vmem:[%s2613_s1 + $0x28] sm:$0xff] (!%p169_p9)   ;;  %s2124_s27 = scalar_lea.vmem (!%p169_p9), %s2559_s22, 256 }
  0x14   : > { %1823 = vmatpush3.bf16.msra.mxu0 (!%p169_p9), %v2033_v6  ;;  %v2042_v15 = vld [vmem:[%s2613_s1 + $0x98] sm:$0xff] (!%p169_p9)   ;;  %v2046_v19 = vld [vmem:[%s2613_s1 + $0xa0] sm:$0xff] (!%p169_p9)   ;;  %v2050_v23 = vld [vmem:[%s2613_s1 + $0xa8] sm:$0xff] (!%p169_p9)   ;;  %p2125_p11 = scmp.ne.s32.totalorder (!%p169_p9), %s2559_s22, %s2124_s27 }
  0x15   : > { %1845 = vmatpush3.bf16.msra.mxu1 %v2034_v7  ;;  %1824 = vmatprep.subr.bf16.mxu0 %v2035_v8  ;;  %s2337_s11 = scalar_select %p198_p10, %s2242_s19, 1  ;;  %v2051_v24 = vld [vmem:[%s2613_s1 + $0x70] sm:$0xff]   ;;  %v2055_v28 = vld [vmem:[%s2613_s1 + $0x78] sm:$0xff]   ;;  %v2065_v36 = vld [vmem:[%s2613_s1 + $0x140] sm:$0xff]  }
  0x16   : > { %1846 = vmatprep.subr.bf16.mxu1 %v2036_v9  ;;  %v2052_v25 = vld [vmem:[%s2613_s1 + $0xf0] sm:$0xff]   ;;  %v2056_v29 = vld [vmem:[%s2613_s1 + $0xf8] sm:$0xff]   ;;  %v2066_v37 = vld [vmem:[%s2613_s1 + $0x100] sm:$0xff]   ;;  %p2126_p12 = pnand %p2125_p11, %p2259_p5 }
  0x17   : > { %s1972_s29 = smul.u32 48, %s2337_s11  ;;  %v2053_v26 = vld [vmem:[%s2613_s1 + $0x30] sm:$0xff]   ;;  %v2057_v30 = vld [vmem:[%s2613_s1 + $0x38] sm:$0xff]   ;;  %v2067_v38 = vld [vmem:[%s2613_s1 + $0x148] sm:$0xff]  }
  0x18   : > { %1825 = vmatpush3.bf16.msra.mxu0 %v2037_v10  ;;  %v2054_v27 = vld [vmem:[%s2613_s1 + $0xb0] sm:$0xff]   ;;  %v2058_v31 = vld [vmem:[%s2613_s1 + $0xb8] sm:$0xff]   ;;  %v2068_v39 = vld [vmem:[%s2613_s1 + $0x108] sm:$0xff]   ;;  %p2127_p13 = pneg %p2126_p12 }
  0x19   : > { %1847 = vmatpush3.bf16.msra.mxu1 %v2038_v11  ;;  %1826 = vmatprep.subr.bf16.mxu0 %v2039_v12  ;;  %s2367_s20 = scalar_lea.vmem %s2612_s0, %s1972_s29  ;;  %v2069_v40 = vld [vmem:[%s2613_s1 + $0x150] sm:$0xff]   ;;  %v2071_v42 = vld [vmem:[%s2613_s1 + $0x158] sm:$0xff]   ;;  %v2073_v44 = vld [vmem:[%s2613_s1 + $0x160] sm:$0xff]  }
  0x1a   : > { %1848 = vmatprep.subr.bf16.mxu1 %v2040_v13  ;;  %v2059_v32 = vld [vmem:[%s2367_s20] ss:$24 sps:$4 sm:$0xff]   ;;  %v2061_v33 = vld [vmem:[%s2367_s20 + $0x4] ss:$24 sps:$4 sm:$0xff]   ;;  %v2070_v41 = vld [vmem:[%s2613_s1 + $0x110] sm:$0xff]  }
  0x1b   : > { %v2062_v34 = vld [vmem:[%s2367_s20 + $0x8] ss:$24 sps:$4 sm:$0xff]   ;;  %v2064_v35 = vld [vmem:[%s2367_s20 + $0xc] ss:$24 sps:$4 sm:$0xff]   ;;  %660 = vmatprep.mubr.bf16.mxu0 %v2061_v33  ;;  %v2072_v43 = vld [vmem:[%s2613_s1 + $0x118] sm:$0xff]  }
  0x1c   : > { %1827 = vmatpush3.bf16.msra.mxu0 %v2041_v14  ;;  %701 = vmatprep.mubr.bf16.mxu1 %v2064_v35  ;;  %v2074_v45 = vld [vmem:[%s2613_s1 + $0x120] sm:$0xff]   ;;  %v2075_v46 = vld [vmem:[%s2613_s1 + $0x168] sm:$0xff]   ;;  %v2077_v49 = vld [vmem:[%s2613_s1 + $0x170] sm:$0xff]  }
  0x1d   : > { %1849 = vmatpush3.bf16.msra.mxu1 %v2042_v15  ;;  %1828 = vmatprep.subr.bf16.mxu0 %v2043_v16  ;;  %v2083_v47 = vld [vmem:[%s2367_s20 + $0x14] ss:$24 sps:$4 sm:$0xff]   ;;  %v2079_v51 = vld [vmem:[%s2613_s1 + $0x178] sm:$0xff]   ;;  %v2081_v53 = vld [vmem:[%s2367_s20 + $0x10] ss:$24 sps:$4 sm:$0xff]   ;;  %s1819_s20 = sshll.u32 %s2242_s19, 8 }
  0x1e   : > { %1850 = vmatprep.subr.bf16.mxu1 %v2044_v17  ;;  %v2076_v48 = vld [vmem:[%s2613_s1 + $0x128] sm:$0xff]   ;;  %v2078_v50 = vld [vmem:[%s2613_s1 + $0x130] sm:$0xff]   ;;  %v2080_v52 = vld [vmem:[%s2613_s1 + $0x138] sm:$0xff]   ;;  %s2556_s14 = scalar_lea.hbm %s2615_s3, %s1819_s20  ;;  %s2193_s19 = smov [#allocation2]  }
  0x1f   : > { %v2084_v54 = vld [vmem:[%s2614_s2] sm:$0xff]   ;;  %v2085_v56 = vld [vmem:[%s2614_s2 + $0x8] sm:$0xff]   ;;  %v2086_v57 = vld [vmem:[%s2614_s2 + $0x10] sm:$0xff]   ;;  %s2128_s28 = sshll.u32 %s2193_s19, 4  ;;  %s2129_s28 = int_to_ptr.vmem [resolvable:$false] %s2128_s28 }
  0x20   : > { %1829 = vmatpush3.bf16.msra.mxu0 %v2045_v18  ;;  %v2087_v58 = vld [vmem:[%s2614_s2 + $0x18] sm:$0xff]   ;;  %v2088_v59 = vld [vmem:[%s2614_s2 + $0x20] sm:$0xff]   ;;  %v2089_v60 = vld [vmem:[%s2614_s2 + $0x28] sm:$0xff]   ;;  %s2130_s29 = scalar_lea.vmem %s2129_s28, 512  ;;  %p2131_p0 = scmp.lt.s32.totalorder %s2559_s22, %s2129_s28 }
  0x21   : > { %1851 = vmatpush3.bf16.msra.mxu1 %v2046_v19  ;;  %1830 = vmatprep.subr.bf16.mxu0 %v2047_v20  ;;  %v2090_v61 = vld [vmem:[%s2614_s2 + $0x30] sm:$0xff]   ;;  %v2091_v62 = vld [vmem:[%s2614_s2 + $0x38] sm:$0xff]   ;;  %p2132_p1 = scmp.lt.s32.totalorder %s2130_s29, %s2124_s27 }
  0x22   : > { %1852 = vmatprep.subr.bf16.mxu1 %v2048_v21 }
  0x23   : > { %p2133_p2 = por %p2132_p1, %p2131_p0 }
  0x24   : > { %1831 = vmatpush3.bf16.msra.mxu0 %v2049_v22 }
  0x25   : > { %1853 = vmatpush3.bf16.msra.mxu1 %v2050_v23  ;;  %1832 = vmatprep.subr.bf16.mxu0 %v2051_v24  ;;  %p2134_p3 = pnand %p2133_p2, %p2127_p13 }
  0x26   : > { %1854 = vmatprep.subr.bf16.mxu1 %v2052_v25 }
  0x28   : > { %1833 = vmatpush3.bf16.msra.mxu0 %v2053_v26 }
  0x29   : > { %1855 = vmatpush3.bf16.msra.mxu1 %v2054_v27  ;;  %1834 = vmatprep.subr.bf16.mxu0 %v2055_v28 }
  0x2a   : > { %1856 = vmatprep.subr.bf16.mxu1 %v2056_v29 }
  0x2c   : > { %1835 = vmatpush3.bf16.msra.mxu0 %v2057_v30 }
  0x2d   : > { %1857 = vmatpush3.bf16.msra.mxu1 %v2058_v31  ;;  %1864 = vmatprep.subr.bf16.mxu0 %v2065_v36 }
  0x2e   : > { %1911 = vmatprep.subr.bf16.mxu1 %v2188_v55 }
  0x2f   : > { %661 = vmatmul.mubr.bf16.vlgmr.msra.gmra.mrb[0].mxu0 %v2059_v32 }
  0x30   : > { %702 = vmatmul.mubr.bf16.vlgmr.msra.gmra.mrb[0].mxu1 %v2062_v34  ;;  %1865 = vmatpush3.bf16.msra.mxu0 %v2066_v37 }
  0x31   : > { %1866 = vmatprep.subr.bf16.mxu0 %v2067_v38  ;;  %742 = vmatprep.mubr.bf16.mxu0 %v2083_v47 }
  0x32   : > { %1912 = vmatpush3.bf16.msra.mxu1 %v2084_v54  ;;  %1927 = vmatprep.mubr.msk.bf16.mxu1 %vm2189_vm0, %v2188_v55 }
  0x33   : > { %1913 = vmatprep.subr.bf16.mxu1 %v2188_v55 }
  0x34   : > { %1867 = vmatpush3.bf16.msra.mxu0 %v2068_v39 }
  0x35   : > { %1868 = vmatprep.subr.bf16.mxu0 %v2069_v40 }
  0x36   : > { %1914 = vmatpush3.bf16.msra.mxu1 %v2085_v56 }
  0x37   : > { %1915 = vmatprep.subr.bf16.mxu1 %v2188_v55 }
  0x38   : > { %1869 = vmatpush3.bf16.msra.mxu0 %v2070_v41 }
  0x39   : > { %1870 = vmatprep.subr.bf16.mxu0 %v2071_v42 }
  0x3a   : > { %1916 = vmatpush3.bf16.msra.mxu1 %v2086_v57 }
  0x3b   : > { %1917 = vmatprep.subr.bf16.mxu1 %v2188_v55 }
  0x3c   : > { %1871 = vmatpush3.bf16.msra.mxu0 %v2072_v43 }
  0x3d   : > { %1872 = vmatprep.subr.bf16.mxu0 %v2073_v44 }
  0x3e   : > { %1918 = vmatpush3.bf16.msra.mxu1 %v2087_v58 }
  0x3f   : > { %1919 = vmatprep.subr.bf16.mxu1 %v2188_v55 }
  0x40   : > { %1873 = vmatpush3.bf16.msra.mxu0 %v2074_v45 }
  0x41   : > { %1874 = vmatprep.subr.bf16.mxu0 %v2075_v46 }
  0x42   : > { %1920 = vmatpush3.bf16.msra.mxu1 %v2088_v59 }
  0x43   : > { %1921 = vmatprep.subr.bf16.mxu1 %v2188_v55 }
  0x44   : > { %1875 = vmatpush3.bf16.msra.mxu0 %v2076_v48 }
  0x45   : > { %1876 = vmatprep.subr.bf16.mxu0 %v2077_v49 }
  0x46   : > { %1922 = vmatpush3.bf16.msra.mxu1 %v2089_v60 }
  0x47   : > { %1923 = vmatprep.subr.bf16.mxu1 %v2188_v55 }
  0x48   : > { %1877 = vmatpush3.bf16.msra.mxu0 %v2078_v50 }
  0x49   : > { %1878 = vmatprep.subr.bf16.mxu0 %v2079_v51 }
  0x4a   : > { %1924 = vmatpush3.bf16.msra.mxu1 %v2090_v61 }
  0x4b   : > { %1925 = vmatprep.subr.bf16.mxu1 %v2188_v55 }
  0x4c   : > { %1879 = vmatpush3.bf16.msra.mxu0 %v2080_v52 }
  0x4e   : > { %1926 = vmatpush3.bf16.msra.mxu1 %v2091_v62 }
  0x4f   : > { %743 = vmatmul.mubr.bf16.vlgmr.msra.gmra.mrb[4].mxu0 %v2081_v53  ;;  %1938 = vmatprep.subr.mxu1 %v2188_v55 }
 0x102   : > { %v1836_v63 = vpop.f32.mrb[0].mxu0 }
 0x103   : > { %v1858_v0 = vpop.f32.mrb[0].mxu1  ;;  %v1837_v1 = vpop.f32.mrb[1].mxu0 }
 0x104   : > { %v1838_v2 = vadd.f32 %v1837_v1, %v1836_v63  ;;  %v1859_v3 = vpop.f32.mrb[1].mxu1  ;;  %v1839_v4 = vpop.f32.mrb[2].mxu0 }
 0x105   : > { %v1860_v5 = vadd.f32 %v1859_v3, %v1858_v0  ;;  %v1861_v6 = vpop.f32.mrb[2].mxu1  ;;  %v1840_v7 = vpop.f32.mrb[3].mxu0 }
 0x106   : > { %v1841_v8 = vadd.f32 %v1840_v7, %v1839_v4  ;;  %v1862_v9 = vpop.f32.mrb[3].mxu1 }
 0x107   : > { %v704_v10 = vadd.f32 %v1860_v5, %v1838_v2  ;;  %v1863_v11 = vadd.f32 %v1862_v9, %v1861_v6 }
 0x109   : > { %v707_v12 = vadd.f32 %v1863_v11, %v1841_v8 }
 0x122   : > { %v1880_v13 = vpop.f32.mrb[4].mxu0 }
 0x123   : > { %v1881_v14 = vpop.f32.mrb[5].mxu0 }
 0x124   : > { %v1882_v15 = vadd.f32 %v1881_v14, %v1880_v13  ;;  %v1883_v16 = vpop.f32.mrb[6].mxu0 }
 0x125   : > { %v1884_v17 = vpop.f32.mrb[7].mxu0 }
 0x126   : > { %v745_v18 = vadd.f32 %v1882_v15, %v704_v10  ;;  %v1885_v19 = vadd.f32 %v1884_v17, %v1883_v16 }
 0x128   : > { %v748_v20 = vadd.f32 %v1885_v19, %v707_v12 }
 0x12a   : > { %v751_v21 = vpack.c.bf16 %v748_v20, %v745_v18 }
 0x12c   : > { %1928 = vmatmul.mubr.bf16.vlgmr.msra.gmra.mrb[4].mxu1 %v751_v21 }
 0x12d   : > { %1940 = vmatprep.mubr.msk.f32.mxu1 %vm2189_vm0, %v2188_v55 }
 0x1ff   : > { %v850_v22 = vpop.f32.mrb[4].mxu1 }
 0x200   : > { %v1929_v23 = vpop.f32.mrb[5].mxu1  ;;  %v857_v24 = vmul.f32 %v850_v22, %v850_v22 }
 0x201   : > { %v853_v25 = vpop.f32.mrb[6].mxu1 }
 0x202   : > { %859 = vadd.xlane.f32.xlu0 %v857_v24  ;;  %v1930_v26 = vpop.f32.mrb[7].mxu1  ;;  %v858_v27 = vmul.f32 %v853_v25, %v853_v25 }
 0x206   : > { %861 = vadd.xlane.f32.xlu0 %v858_v27 }
 0x28f   : > { %v860_v28 = vpop.xlane.xlu0 %859 }
 0x290   : > { %v863_v29 = vmax.f32 %v860_v28, 1e-24 }
 0x292   : > { %2092 = vrsqrt.f32 %v863_v29 }
 0x293   : > { %v862_v30 = vpop.xlane.xlu0 %861 }
 0x294   : > { %v864_v31 = vmax.f32 %v862_v30, 1e-24 }
 0x296   : > { %2094 = vrsqrt.f32 %v864_v31 }
 0x29c   : > { %v2093_v32 = vpop.eup %2092 }
 0x29d   : > { %v867_v33 = vmul.f32 %v2093_v32, %v850_v22 }
 0x29f   : > { %869 = vst [vmem:[%s2469_s7] sm:$0xff] %v867_v33  ;;  %1935 = vmatprep.mubr.f32.mxu0 %v867_v33 }
 0x2a0   : > { %v2095_v34 = vpop.eup %2094 }
 0x2a1   : > { %v868_v35 = vmul.f32 %v2095_v34, %v853_v25 }
 0x2a3   : > { %v1968_v36 = vpack.c.bf16 %v868_v35, %v867_v33  ;;  %870 = vst [vmem:[%s2469_s7 + $0x8] sm:$0xff] %v868_v35 }
 0x2a5   : > { %1969 = vmatprep.subr.bf16.mxu0 %v1968_v36 }
 0x2a6   : > { %1971 = vmatpush3.bf16.xpose.msra.mxu0 %v1968_v36 }
 0x2a7   : > { %1943 = vmatprep.subr.mxu0 %v2188_v55 }
 0x2ad   : > { %1936 = vmatmul.mubr.f32.vlgmr.msra.gmra.mrb[8].mxu0 %v868_v35 }
 0x2ae   : > { %1945 = vmatprep.mubr.msk.f32.mxu0 %vm2189_vm0, %v2188_v55 }
 0x380   : > { %v1937_v37 = vpop.f32.mrb[8].mxu0 }
 0x381   : > { %v978_v38 = vmul.f32 14.285714, %v1937_v37  ;;  %v937_v39 = vpop.f32.mrb[9].mxu0 }
 0x382   : > { %v946_v40 = vmul.f32 14.285714, %v937_v39 }
 0x383   : > { %v979_v41 = vmul.f32 1.442695, %v978_v38 }
 0x384   : > { %v947_v42 = vmul.f32 1.442695, %v946_v40 }
 0x385   : > { %2096 = vpow2.f32 %v979_v41 }
 0x386   : > { %2098 = vpow2.f32 %v947_v42 }
 0x38f   : > { %v2097_v43 = vpop.eup %2096 }
 0x390   : > { %v2099_v44 = vpop.eup %2098  ;;  %v1799_v46 = vadd.f32 -1.0, %v2097_v43 }
 0x391   : > { %v1798_v45 = vadd.f32 -1.0, %v2099_v44 }
 0x392   : > { %v2478_v48 = vmul.f32 %v1799_v46, %v1799_v46 }
 0x393   : > { %v950_v47 = vmul.f32 %v1798_v45, %v1798_v45 }
 0x395   : > { %952 = vrot.lane.b32.xlu0 %v950_v47, %s2190_s8  ;;  %969 = vrot.lane.b32.xlu1 %v950_v47, %s2191_s9  ;;  %v963_v56 = vsel %vm962_vm1, %v950_v47, 0.0 }
 0x399   : > { %984 = vrot.lane.b32.xlu1 %v2478_v48, %s2190_s8 }
 0x407   : > { %v970_v49 = vpop.permute.xlu1 %969  ;;  %v953_v51 = vpop.permute.xlu0 %952 }
 0x408   : > { %v972_v50 = vsel %vm962_vm1, %v970_v49, 0.0  ;;  %v956_v53 = vsel %vm955_vm2, %v953_v51, 0.0 }
 0x409   : > { %973 = vadd.xlane.f32.xlu1 %v972_v50 }
 0x40b   : > { %v985_v52 = vpop.permute.xlu1 %984 }
 0x40c   : > { %v987_v54 = vsel %vm955_vm2, %v985_v52, 0.0 }
 0x40d   : > { %957 = vadd.xlane.f32.xlu1 %v956_v53  ;;  %988 = vadd.xlane.f32.xlu0 %v987_v54 }
 0x411   : > { %964 = vadd.xlane.f32.xlu1 %v963_v56 }
 0x496   : > { %v974_v57 = vpop.xlane.xlu1 %973 }
 0x497   : > { %v975_v58 = vadd.f32 1e-05, %v974_v57 }
 0x499   : > { %2100 = vrcp.f32 %v975_v58 }
 0x49a   : > { %v989_v59 = vpop.xlane.xlu0 %988  ;;  %v958_v60 = vpop.xlane.xlu1 %957 }
 0x49b   : > { %v990_v61 = vadd.f32 1e-05, %v989_v59  ;;  %v959_v62 = vadd.f32 1e-05, %v958_v60 }
 0x49d   : > { %2102 = vrcp.f32 %v990_v61 }
 0x49e   : > { %2104 = vrcp.f32 %v959_v62  ;;  %v965_v63 = vpop.xlane.xlu1 %964 }
 0x49f   : > { %v966_v0 = vadd.f32 1e-05, %v965_v63 }
 0x4a1   : > { %2106 = vrcp.f32 %v966_v0 }
 0x4a3   : > { %v2101_v1 = vpop.eup %2100 }
 0x4a4   : > { %v977_v2 = vmul.f32 %v2101_v1, %v950_v47 }
 0x4a6   : > { %v1019_v3 = vrot.slane %v977_v2, 4 }
 0x4a7   : > { %v2103_v4 = vpop.eup %2102 }
 0x4a8   : > { %v2105_v5 = vpop.eup %2104  ;;  %1020 = vrot.lane.b32.xlu1 %v1019_v3, %s2191_s9  ;;  %v992_v6 = vmul.f32 %v2103_v4, %v2478_v48 }
 0x4a9   : > { %v961_v7 = vmul.f32 %v2105_v5, %v950_v47 }
 0x4aa   : > { %1099 = vrot.lane.b32.xlu0 %v992_v6, %s2190_s8 }
 0x4ab   : > { %v2107_v8 = vpop.eup %2106 }
 0x4ac   : > { %v968_v9 = vmul.f32 %v2107_v8, %v950_v47  ;;  %1016 = vrot.lane.b32.xlu1 %v961_v7, %s2190_s8 }
 0x4ae   : > { %v1102_v10 = vrot.slane %v968_v9, 4 }
 0x4b0   : > { %1002 = vrot.lane.b32.xlu1 %v2478_v48, %s2191_s9  ;;  %1944 = vmatpush3.msk.msra.mxu0 %vm1025_vm3, %v1102_v10 }
 0x4b1   : > { %1953 = vmatprep.subr.mxu0 %v2188_v55 }
 0x4b4   : > { %993 = vrot.lane.b32.xlu1 %v2478_v48, %s2192_s10 }
 0x51a   : > { %v1021_v11 = vpop.permute.xlu1 %1020 }
 0x51b   : > { %1939 = vmatpush3.msk.msra.mxu1 %vm1025_vm3, %v1021_v11 }
 0x51c   : > { %v1100_v12 = vpop.permute.xlu0 %1099  ;;  %1948 = vmatprep.subr.mxu1 %v2188_v55 }
 0x51d   : > { %1946 = vmatmul.mubr.msk.f32.vlgmr.msra.gmra.mrb[10].mxu0 %vm1022_vm4, %v1100_v12 }
 0x51e   : > { %v1017_v13 = vpop.permute.xlu1 %1016  ;;  %1955 = vmatprep.mubr.msk.f32.mxu0 %vm2189_vm0, %v2188_v55 }
 0x51f   : > { %1941 = vmatmul.mubr.msk.f32.vlgmr.msra.gmra.mrb[8].mxu1 %vm1022_vm4, %v1017_v13 }
 0x520   : > { %1950 = vmatprep.mubr.msk.f32.mxu1 %vm2189_vm0, %v2188_v55 }
 0x522   : > { %v1003_v14 = vpop.permute.xlu1 %1002 }
 0x523   : > { %v1005_v15 = vsel %vm962_vm1, %v1003_v14, 0.0 }
 0x524   : > { %1006 = vadd.xlane.f32.xlu1 %v1005_v15 }
 0x526   : > { %v994_v16 = vpop.permute.xlu1 %993 }
 0x527   : > { %v996_v17 = vsel %vm955_vm2, %v994_v16, 0.0 }
 0x528   : > { %997 = vadd.xlane.f32.xlu0 %v996_v17 }
 0x5b1   : > { %v1007_v18 = vpop.xlane.xlu1 %1006 }
 0x5b2   : > { %v1008_v19 = vadd.f32 1e-05, %v1007_v18 }
 0x5b4   : > { %2108 = vrcp.f32 %v1008_v19 }
 0x5b5   : > { %v998_v20 = vpop.xlane.xlu0 %997 }
 0x5b6   : > { %v999_v21 = vadd.f32 1e-05, %v998_v20 }
 0x5b8   : > { %2110 = vrcp.f32 %v999_v21 }
 0x5be   : > { %v2109_v22 = vpop.eup %2108 }
 0x5bf   : > { %v1010_v23 = vmul.f32 %v2109_v22, %v2478_v48 }
 0x5c1   : > { %v1401_v24 = vrot.slane %v1010_v23, 4 }
 0x5c2   : > { %v2111_v25 = vpop.eup %2110 }
 0x5c3   : > { %1402 = vrot.lane.b32.xlu1 %v1401_v24, %s2191_s9  ;;  %v1001_v26 = vmul.f32 %v2111_v25, %v2478_v48  ;;  %v1011_v48 = vlaneseq }
 0x5c5   : > { %1326 = vrot.lane.b32.xlu0 %v1001_v26, %s2192_s10  ;;  %v2523_v50 = vand.u32 127, %v1011_v48  ;;  %v2529_v63 = vshrl.u32 %v1011_v48, 7 }
 0x5c7   : > { %vm1267_vm7 = vcmp.eq.s32.totalorder %v2529_v63, %v2523_v50 }
 0x5f0   : > { %v1173_v27 = vpop.f32.mrb[10].mxu0 }
 0x5f1   : > { %v1947_v28 = vpop.f32.mrb[11].mxu0  ;;  %1949 = vmatpush3.msk.msra.mxu1 %vm1025_vm3, %v1173_v27 }
 0x5f2   : > { %v1094_v29 = vpop.f32.mrb[8].mxu1  ;;  %1958 = vmatprep.subr.mxu1 %v2188_v55 }
 0x5f3   : > { %v1942_v30 = vpop.f32.mrb[9].mxu1  ;;  %1951 = vmatmul.mubr.msk.f32.vlgmr.msra.gmra.mrb[10].mxu1 %vm1022_vm4, %v1094_v29 }
 0x5f4   : > { %1959 = vmatpush3.msk.msra.mxu1 %vm1025_vm3, %v1173_v27  ;;  %1960 = vmatprep.mubr.msk.f32.mxu1 %vm2189_vm0, %v2188_v55 }
 0x635   : > { %v1403_v31 = vpop.permute.xlu1 %1402 }
 0x636   : > { %1961 = vmatmul.mubr.msk.f32.vlgmr.msra.gmra.mrb[12].mxu1 %vm1022_vm4, %v1403_v31 }
 0x637   : > { %v1327_v32 = vpop.permute.xlu0 %1326 }
 0x638   : > { %1954 = vmatpush3.msk.msra.mxu0 %vm1025_vm3, %v1327_v32 }
 0x639   : > { %1956 = vmatmul.mubr.msk.f32.vlgmr.msra.gmra.mrb[12].mxu0 %vm1022_vm4, %v1094_v29  ;;  %1963 = vmatprep.subr.mxu0 %v2188_v55 }
 0x63a   : > { %1965 = vmatprep.mubr.msk.f32.mxu0 %vm2189_vm0, %v2188_v55 }
 0x6c6   : > { %v1249_v33 = vpop.f32.mrb[10].mxu1 }
 0x6c7   : > { %v1250_v34 = vadd.f32 1e-20, %v1249_v33  ;;  %v1952_v35 = vpop.f32.mrb[11].mxu1 }
 0x6c9   : > { %2112 = vlog2.f32 %v1250_v34 }
 0x6d3   : > { %v2113_v36 = vpop.eup %2112 }
 0x6d4   : > { %v1254_v37 = vmul.f32 0.6931472, %v2113_v36 }
 0x6d6   : > { %v1255_v38 = vsel %vm955_vm2, %v1254_v37, -inf  ;;  %v1268_v9 = vsel %vm1267_vm7, %v1254_v37, 0.0 }
 0x6d7   : > { %1256 = vmax.xlane.f32.xlu1 %v1255_v38  ;;  %v1269_v10 = vsel %vm955_vm2, %v1268_v9, 0.0 }
 0x709   : > { %v1472_v39 = vpop.f32.mrb[12].mxu1 }
 0x70a   : > { %v1962_v40 = vpop.f32.mrb[13].mxu1  ;;  %1964 = vmatpush3.msk.msra.mxu0 %vm1025_vm3, %v1472_v39 }
 0x70c   : > { %v1396_v41 = vpop.f32.mrb[12].mxu0 }
 0x70d   : > { %v1957_v42 = vpop.f32.mrb[13].mxu0  ;;  %1966 = vmatmul.mubr.msk.f32.vlgmr.msra.gmra.mrb[14].mxu0 %vm1022_vm4, %v1396_v41 }
 0x764   : > { %v1257_v43 = vpop.xlane.xlu1 %1256 }
 0x765   : > { %v1258_v47 = vsub.f32 %v1254_v37, %v1257_v43  ;;  %vm1285_vm5 = vcmp.ge.f32.partialorder %v1254_v37, %v1257_v43 }
 0x766   : > { %v1286_v51 = vsel %vm1285_vm5, %v2523_v50, 4 }
 0x767   : > { %v1259_v49 = vmul.f32 1.442695, %v1258_v47  ;;  %v1287_v52 = vsel %vm955_vm2, %v1286_v51, 2147483647 }
 0x768   : > { %v1289_v56 = vshra.s32 %v1287_v52, 16  ;;  %v1288_v62 = vand.u32 65535, %v1287_v52 }
 0x76a   : > { %v1291_v58 = vcvt.s32.f32 %v1289_v56  ;;  %v1290_v5 = vcvt.s32.f32 %v1288_v62 }
 0x7e0   : > { %v1548_v44 = vpop.f32.mrb[14].mxu0 }
 0x7e1   : > { %v1549_v45 = vadd.f32 1e-20, %v1548_v44  ;;  %v1967_v46 = vpop.f32.mrb[15].mxu0 }
 0x7e3   : > { %2114 = vlog2.f32 %v1549_v45 }
 0x7e4   : > { %2116 = vpow2.f32 %v1259_v49 }
 0x7ed   : > { %v2115_v53 = vpop.eup %2114 }
 0x7ee   : > { %v1553_v54 = vmul.f32 0.6931472, %v2115_v53  ;;  %v2117_v59 = vpop.eup %2116 }
 0x7ef   : > { %v1261_v60 = vsel %vm955_vm2, %v2117_v59, 0.0 }
 0x7f0   : > { %v1554_v57 = vsel %vm955_vm2, %v1553_v54, -inf  ;;  %v1566_v27 = vsel %vm1267_vm7, %v1553_v54, 0.0 }
 0x7f1   : > { %1555 = vmax.xlane.f32.xlu0 %v1554_v57  ;;  %v1567_v29 = vsel %vm955_vm2, %v1566_v27, 0.0 }
 0x7f5   : > { %1292 = vmin.xlane.f32.xlu0 %v1291_v58 }
 0x7f9   : > { %1262 = vadd.xlane.f32.xlu0 %v1261_v60 }
 0x87e   : > { %v1556_v61 = vpop.xlane.xlu0 %1555 }
 0x87f   : > { %v1557_v0 = vsub.f32 %v1553_v54, %v1556_v61  ;;  %vm1582_vm6 = vcmp.ge.f32.partialorder %v1553_v54, %v1556_v61 }
 0x880   : > { %v1583_v1 = vsel %vm1582_vm6, %v2523_v50, 4 }
 0x881   : > { %v1558_v2 = vmul.f32 1.442695, %v1557_v0  ;;  %v1584_v3 = vsel %vm955_vm2, %v1583_v1, 2147483647 }
 0x882   : > { %v1293_v4 = vpop.xlane.xlu0 %1292  ;;  %v1586_v6 = vshra.s32 %v1584_v3, 16  ;;  %v1585_v16 = vand.u32 65535, %v1584_v3 }
 0x883   : > { %2118 = vpow2.f32 %v1558_v2  ;;  %vm1294_vm8 = vcmp.eq.f32.partialorder %v1291_v58, %v1293_v4  ;;  %v1299_v15 = vcvt.f32.s32 %v1293_v4 }
 0x884   : > { %v1295_v7 = vsel %vm1294_vm8, %v1290_v5, inf  ;;  %v1588_v8 = vcvt.s32.f32 %v1586_v6  ;;  %v1587_v22 = vcvt.s32.f32 %v1585_v16 }
 0x885   : > { %1296 = vmin.xlane.f32.xlu0 %v1295_v7  ;;  %v1300_v19 = vshll.u32 %v1299_v15, 16 }
 0x886   : > { %1589 = vmin.xlane.f32.xlu1 %v1588_v8  ;;  %v1263_v13 = vpop.xlane.xlu0 %1262 }
 0x887   : > { %2120 = vlog2.f32 %v1263_v13 }
 0x889   : > { %1270 = vadd.xlane.f32.xlu0 %v1269_v10 }
 0x88d   : > { %v2119_v11 = vpop.eup %2118 }
 0x88e   : > { %v1560_v12 = vsel %vm955_vm2, %v2119_v11, 0.0 }
 0x88f   : > { %1561 = vadd.xlane.f32.xlu1 %v1560_v12 }
 0x891   : > { %v2121_v14 = vpop.eup %2120 }
 0x892   : > { %v1265_v17 = vmul.f32 0.6931472, %v2121_v14 }
 0x894   : > { %v1266_v25 = vadd.f32 %v1265_v17, %v1257_v43 }
 0x912   : > { %v1297_v18 = vpop.xlane.xlu0 %1296 }
 0x913   : > { %v1298_v20 = vcvt.f32.s32 %v1297_v18  ;;  %v1590_v21 = vpop.xlane.xlu1 %1589 }
 0x914   : > { %vm1591_vm9 = vcmp.eq.f32.partialorder %v1588_v8, %v1590_v21  ;;  %v1596_v35 = vcvt.f32.s32 %v1590_v21 }
 0x915   : > { %v1301_v23 = vadd.s32 %v1300_v19, %v1298_v20  ;;  %v1592_v24 = vsel %vm1591_vm9, %v1587_v22, inf }
 0x916   : > { %1593 = vmin.xlane.f32.xlu1 %v1592_v24  ;;  %v1271_v26 = vpop.xlane.xlu0 %1270  ;;  %v1597_v38 = vshll.u32 %v1596_v35, 16 }
 0x917   : > { %v1272_v28 = vsub.f32 %v1266_v25, %v1271_v26  ;;  %vm1302_vm11 = vcmp.eq.s32.totalorder %v1301_v23, %v2529_v63 }
 0x918   : > { %v1806_v31 = vsel %vm1302_vm11, 1.0, %v2188_v55 }
 0x919   : > { %v1274_v30 = vsel %vm1273_vm10, %v1272_v28, 0.0  ;;  %v1305_v32 = vsel %vm1273_vm10, %v1806_v31, 0.0 }
 0x91a   : > { %1568 = vadd.xlane.f32.xlu1 %v1567_v29  ;;  %1275 = vadd.xlane.f32.xlu0 %v1274_v30 }
 0x91c   : > { %v1562_v33 = vpop.xlane.xlu1 %1561 }
 0x91d   : > { %2122 = vlog2.f32 %v1562_v33 }
 0x91e   : > { %1306 = vadd.xlane.f32.xlu1 %v1305_v32 }
 0x927   : > { %v2123_v34 = vpop.eup %2122 }
 0x928   : > { %v1564_v36 = vmul.f32 0.6931472, %v2123_v34 }
 0x92a   : > { %v1565_v41 = vadd.f32 %v1564_v36, %v1556_v61 }
 0x9a3   : > { %v1594_v37 = vpop.xlane.xlu1 %1593 }
 0x9a4   : > { %v1595_v39 = vcvt.f32.s32 %v1594_v37 }
 0x9a6   : > { %v1598_v40 = vadd.s32 %v1597_v38, %v1595_v39 }
 0x9a7   : > { %v1569_v42 = vpop.xlane.xlu1 %1568  ;;  %v1276_v43 = vpop.xlane.xlu0 %1275 }
 0x9a8   : > { %v1570_v44 = vsub.f32 %v1565_v41, %v1569_v42  ;;  %v1277_v45 = vrot.slane %v1276_v43, 4  ;;  %vm1599_vm12 = vcmp.eq.s32.totalorder %v1598_v40, %v2529_v63 }
 0x9a9   : > { %v1813_v46 = vsel %vm1599_vm12, 1.0, %v2188_v55 }
 0x9aa   : > { %v1278_v47 = vadd.f32 %v1277_v45, %v1276_v43  ;;  %v1602_v48 = vsel %vm1273_vm10, %v1813_v46, 0.0  ;;  %v1571_v49 = vsel %vm1273_vm10, %v1570_v44, 0.0 }
 0x9ab   : > { %1603 = vadd.xlane.f32.xlu1 %v1602_v48  ;;  %v1307_v51 = vpop.xlane.xlu1 %1306  ;;  %1572 = vadd.xlane.f32.xlu0 %v1571_v49 }
 0x9ac   : > { %v1279_v52 = vrot.slane %v1278_v47, 2  ;;  %v1308_v53 = vrot.slane %v1307_v51, 4 }
 0x9ae   : > { %v1309_v54 = vadd.f32 %v1308_v53, %v1307_v51  ;;  %v1280_v56 = vadd.f32 %v1279_v52, %v1278_v47 }
 0x9b0   : > { %v1310_v57 = vrot.slane %v1309_v54, 2  ;;  %v1281_v58 = vrot.slane %v1280_v56, 1 }
 0x9b2   : > { %v1282_v59 = vadd.f32 %v1281_v58, %v1280_v56  ;;  %v1311_v55 = vadd.f32 %v1310_v57, %v1309_v54 }
 0x9b4   : > { %1973 = vpush %v1282_v59  ;;  %v1312_v60 = vrot.slane %v1311_v55, 1 }
 0x9b6   : > { %v1313_v61 = vadd.f32 %v1312_v60, %v1311_v55 }
 0x9b8   : > { %1975 = vpush %v1313_v61 }
 0x9b9   : > { %2137 = shalt.err (!%p2134_p3)
}
 0x9ba   : > { %s2138_s30 = scalar_lea.hbm %s2556_s14, 256  ;;  %s2142_s7 = scalar_lea.hbm %s2615_s3, 512 }
 0x9bb   : > { %p2139_p4 = scmp.ne.s32.totalorder %s2556_s14, %s2138_s30  ;;  %p2143_p9 = scmp.lt.u32.totalorder %s2556_s14, %s2615_s3 }
 0x9bc   : > { %p2144_p10 = scmp.lt.u32.totalorder %s2142_s7, %s2138_s30  ;;  %p2146_p12 = scmp.lt.u32.totalorder %s2138_s30, %s2556_s14 }
 0x9bd   : > { %p2140_p7 = pnand %p2139_p4, %p2259_p5 }
 0x9be   : > { %p2145_p11 = por %p2144_p10, %p2143_p9 }
 0x9bf   : > { %p2141_p8 = pneg %p2140_p7 }
 0x9c0   : > { %p2147_p13 = por %p2146_p12, %p2145_p11 }
 0x9c2   : > { %p2148_p0 = pnand %p2147_p13, %p2141_p8 }
 0x9c4   : > { %2151 = shalt.err (!%p2148_p0)
}
 0x9c5   : > { %s2194_s10 = smov 128   ;;  %s2195_s20 = smov 8   ;;  %vm1316_vm13 = vcmp.eq.s32.totalorder %v2529_v63, 0  ;;  %vm1317_vm14 = vcmp.eq.s32.totalorder %v2523_v50, 0  ;;  %vm1321_vm15 = vcmp.eq.s32.totalorder %v2523_v50, 1  ;;  %vm1613_vm0 = vcmp.eq.s32.totalorder %v2529_v63, 1 }
 0x9c6   : > { %1981 = dma.vmem_to_hbm [thread:$0]  (%p2259_p5), %s2559_s22, 256, %s2556_s14, %s2563_s23, %s2194_s10, %s2194_s10, %s2195_s20   ;;  %vm1318_vm1 = vmand %vm1316_vm13, %vm1317_vm14  ;;  %vm1620_vm5 = vcmask 9216  }
 0x9c7   : > { %vm1322_vm2 = vmand %vm1316_vm13, %vm1321_vm15  ;;  %s1735_s23 = sshll.u32 %s2337_s11, 1 }
 0x9c8   : > { %vm1614_vm3 = vmand %vm1613_vm0, %vm1317_vm14  ;;  %s206_s5 = scalar_lea.vmem %s2616_s4, %s1735_s23 }
 0x9c9   : > { %vm1617_vm4 = vmand %vm1613_vm0, %vm1321_vm15 }
 0x9e5   : > { %s1974_s12 = spop %1973 }
 0x9e6   : > { %s1284_s13 = smul.f32 0.25, %s1974_s12 }
 0x9e8   : > { %v1319_v13 = vstv %s1284_s13 }
 0x9e9   : > { %s1976_s25 = spop %1975  ;;  %v1320_v15 = vsel %vm1318_vm1, %v1319_v13, 0.0 }
 0x9ea   : > { %s1315_s14 = smul.f32 0.25, %s1976_s25 }
 0x9ec   : > { %v1323_v14 = vstv %s1315_s14 }
 0x9ed   : > { %v1324_v16 = vsel %vm1322_vm2, %v1323_v14, %v1320_v15 }
 0xa38   : > { %v1604_v62 = vpop.xlane.xlu1 %1603  ;;  %v1573_v0 = vpop.xlane.xlu0 %1572 }
 0xa39   : > { %v1605_v1 = vrot.slane %v1604_v62, 4  ;;  %v1574_v2 = vrot.slane %v1573_v0, 4 }
 0xa3b   : > { %v1606_v3 = vadd.f32 %v1605_v1, %v1604_v62  ;;  %v1575_v4 = vadd.f32 %v1574_v2, %v1573_v0 }
 0xa3d   : > { %v1607_v5 = vrot.slane %v1606_v3, 2  ;;  %v1576_v6 = vrot.slane %v1575_v4, 2 }
 0xa3f   : > { %v1608_v7 = vadd.f32 %v1607_v5, %v1606_v3  ;;  %v1577_v8 = vadd.f32 %v1576_v6, %v1575_v4 }
 0xa41   : > { %v1578_v9 = vrot.slane %v1577_v8, 1  ;;  %v1609_v10 = vrot.slane %v1608_v7, 1 }
 0xa43   : > { %v1579_v11 = vadd.f32 %v1578_v9, %v1577_v8  ;;  %v1610_v12 = vadd.f32 %v1609_v10, %v1608_v7 }
 0xa45   : > { %1977 = vpush %v1579_v11 }
 0xa46   : > { %1979 = vpush %v1610_v12 }
 0xa76   : > { %s1978_s22 = spop %1977 }
 0xa77   : > { %s1581_s27 = smul.f32 0.25, %s1978_s22  ;;  %s1980_s19 = spop %1979 }
 0xa78   : > { %s1612_s28 = smul.f32 0.25, %s1980_s19 }
 0xa79   : > { %v1615_v17 = vstv %s1581_s27 }
 0xa7a   : > { %v1616_v50 = vsel %vm1614_vm3, %v1615_v17, %v1324_v16  ;;  %v1618_v63 = vstv %s1612_s28 }
 0xa7b   : > { %v1619_v18 = vsel %vm1617_vm4, %v1618_v63, %v1616_v50 }
 0xa7c   : > { %1621 = vst.msk [vmem:[%s206_s5] sm:$0x3] %vm1620_vm5, %v1619_v18 }
 0xa7d PF: > { %p1987_p5 = scmp.ge.s32.totalorder %s2186_s18, 2  ;;  %s1658_s11 = sand.u32 1, %s2174_s15  }
 0xa7e   : > { %s1659_s6 = scalar_lea.sflag [#allocation3], %s1658_s11 }
 0xa7f   : > { %p1984_p1 = pnand %p1987_p5, %p2263_p6 }
 0xa81   : > { %2169 = dma.done.wait (!%p1984_p1), %s1659_s6, 256  }
 0xa82   : > { %2171 = vsyncadd (!%p1984_p1), %s1659_s6, 4294967040  ;;  %p15_p2 = scmp.ge.s32.totalorder %s2246_s21, 4   ;;  %s2619_s15 = smov %s2178_s16 }
 0xa83   : > { %s2620_s16 = smov %s2182_s17  ;;  %s2621_s17 = smov %s2257_s24 }
 0xa84   : > { %s2622_s18 = smov %s2246_s21  ;;  %17 = sbr.rel (!%p15_p2) target bundleno = 3 (0x3), region = 79 }
 0xa8b   :  { %1671 = vsyncpa [#allocation3], 1 }
 0xa8c   :  { %1673 = vsyncpa [#allocation3 + $0x1], 1 }

</bundles_post_ra>
